<compile_context>
chip_gen: v6e
topology: v6e:2x2x1
jax: 0.10.0
libtpu: 0.0.40
codegen_flags: <defaults>
</compile_context>

<pallas_src>
import jax
import jax.numpy as jnp
from jax.experimental import pallas as pl
from jax.experimental.pallas import tpu as pltpu

IN_F = 768
HID = 64
OUT = 4


def _fc_kernel(x_ref, wf_ref, bf_ref, o_ref):
    # Cast the streamed tile to the MXU dtype in-register (free VPU work),
    # matmul with f32 accumulation, add bias, store the narrow (tb, 4) tile.
    x = x_ref[...].astype(wf_ref.dtype)
    y = jnp.dot(x, wf_ref[...], preferred_element_type=jnp.float32)
    o_ref[...] = (y + bf_ref[...]).astype(o_ref.dtype)


def _round_up(x, m):
    return -(-x // m) * m


def fc_model(x, w1, b1, w2, b2, *, block_b=1024, mxu_dtype=jnp.bfloat16):
    """Eval-mode forward of _FCModel: (B, 768) float32 -> (B, 4) float32.

    Weights are stored (in_features, out_features); biases are (1, out_features).
    block_b: max batch-tile rows. 1024 f32 rows double-buffered fits v5e's
             16 MiB default scoped VMEM; v6e can sweep higher (marginal).
    mxu_dtype: dtype fed to the MXU (accumulation is always f32). bf16 keeps the
               matmul well under the x-stream DMA time on all generations.
    """
    B = x.shape[0]
    assert x.shape[1] == IN_F

    # Algebraic fusion of the two linears (valid: no nonlinearity, dropout=identity).
    wf = (w1 @ w2).astype(mxu_dtype)                           # (768, 4)
    bf = (b1 @ w2 + b2).astype(jnp.float32).reshape(1, OUT)    # (1, 4)

    # Batch tiling. Sublane alignment: 8 for a 32-bit x stream, 16 if x is bf16.
    align = 16 if x.dtype == jnp.bfloat16 else 8
    if B <= align:
        tb = B  # single full-extent block (legal block shape for any B)
    else:
        # Cap the tile so the grid has >= 2 steps (v7x: two TensorCores share the
        # "parallel" batch axis) and never exceeds block_b rows.
        tb = min(_round_up(block_b, align), _round_up(pl.cdiv(B, 2), align))
    grid = (pl.cdiv(B, tb),)
    # When B % tb != 0 the last block overhangs: reads are padded, writes masked
    # by Pallas -- safe because every output row depends only on its own input row.

    cost = pl.CostEstimate(
        flops=2 * B * IN_F * OUT,
        transcendentals=0,
        bytes_accessed=(
            x.size * x.dtype.itemsize
            + wf.size * wf.dtype.itemsize
            + bf.size * bf.dtype.itemsize
            + B * OUT * 4
        ),
    )

    return pl.pallas_call(
        _fc_kernel,
        out_shape=jax.ShapeDtypeStruct((B, OUT), jnp.float32),
        grid=grid,
        in_specs=[
            pl.BlockSpec((tb, IN_F), lambda i: (i, 0)),    # streamed x tiles
            pl.BlockSpec((IN_F, OUT), lambda i: (0, 0)),   # folded weight, VMEM-resident
            pl.BlockSpec((1, OUT), lambda i: (0, 0)),      # folded bias, VMEM-resident
        ],
        out_specs=pl.BlockSpec((tb, OUT), lambda i: (i, 0)),
        compiler_params=pltpu.CompilerParams(
            dimension_semantics=("parallel",),
        ),
        cost_estimate=cost,
    )(x, wf, bf)


def init_params(key):
    """Deterministic init mimicking nn.Linear default (uniform +- 1/sqrt(fan_in))."""
    k1, k2, k3, k4 = jax.random.split(key, 4)
    bound1 = 1.0 / jnp.sqrt(IN_F)
    bound2 = 1.0 / jnp.sqrt(HID)
    w1 = jax.random.uniform(k1, (IN_F, HID), jnp.float32, -bound1, bound1)
    b1 = jax.random.uniform(k2, (1, HID), jnp.float32, -bound1, bound1)
    w2 = jax.random.uniform(k3, (HID, OUT), jnp.float32, -bound2, bound2)
    b2 = jax.random.uniform(k4, (1, OUT), jnp.float32, -bound2, bound2)
    return w1, b1, w2, b2


if __name__ == "__main__":
    key = jax.random.PRNGKey(0)
    kx, kp = jax.random.split(key)
    w1, b1, w2, b2 = init_params(kp)

    # bf16 MXU operands (f32 accumulation) -> compare against the f32 reference
    # with a tolerance sized for bf16 operand rounding (~0.5% relative here).
    ATOL = RTOL = 3e-2

    # Case 1: tiny batch -> single full-extent tile (tb = B = 4).
    B = 4
    x = jax.random.normal(kx, (B, IN_F), jnp.float32)
    out = jax.block_until_ready(fc_model(x, w1, b1, w2, b2))
    ref = (x @ w1 + b1) @ w2 + b2
    assert out.shape == (B, OUT)
    assert jnp.allclose(out, ref, atol=ATOL, rtol=RTOL), float(jnp.max(jnp.abs(out - ref)))

    # Case 2: ragged multi-tile batch (tb=8 -> grid of 3, partial last block masked).
    B2 = 20
    x2 = jax.random.normal(jax.random.PRNGKey(1), (B2, IN_F), jnp.float32)
    out2 = jax.block_until_ready(fc_model(x2, w1, b1, w2, b2, block_b=8))
    ref2 = (x2 @ w1 + b1) @ w2 + b2
    assert out2.shape == (B2, OUT)
    assert jnp.allclose(out2, ref2, atol=ATOL, rtol=RTOL), float(jnp.max(jnp.abs(out2 - ref2)))

    # Case 3: default block_b -> tile capped at round_up(cdiv(B,2)) so the grid has
    # 2 steps (v7x two-core path) with a partial last block.
    B3 = 20
    x3 = jax.random.normal(jax.random.PRNGKey(2), (B3, IN_F), jnp.float32)
    out3 = jax.block_until_ready(fc_model(x3, w1, b1, w2, b2))
    ref3 = (x3 @ w1 + b1) @ w2 + b2
    assert out3.shape == (B3, OUT)
    assert jnp.allclose(out3, ref3, atol=ATOL, rtol=RTOL), float(jnp.max(jnp.abs(out3 - ref3)))

    print("KERNEL_OK")
</pallas_src>

<mosaic_0001>
module attributes {stable_mosaic.version = 11 : i64} {
  func.func @_fc_kernel(%arg0: i32, %arg1: memref<4x768xf32, #tpu.memory_space<vmem>>, %arg2: memref<768x4xbf16, #tpu.memory_space<vmem>>, %arg3: memref<1x4xf32, #tpu.memory_space<vmem>>, %arg4: memref<4x4xf32, #tpu.memory_space<vmem>>) attributes {dimension_semantics = [#tpu.dimension_semantics<parallel>], iteration_bounds = array<i64: 1>, scalar_prefetch = 0 : i64, scratch_operands = 0 : i64, tpu.core_type = #tpu.core_type<tc>, window_params = [{transform_indices = @transform_0, window_bounds = array<i64: 4, 768>}, {pipeline_mode = #tpu.pipeline_mode<synchronous>, transform_indices = @transform_1, window_bounds = array<i64: 768, 4>}, {pipeline_mode = #tpu.pipeline_mode<synchronous>, transform_indices = @transform_2, window_bounds = array<i64: 1, 4>}, {transform_indices = @transform_3, window_bounds = array<i64: 4, 4>}]} {
    %c0 = arith.constant 0 : index
    %c0_0 = arith.constant 0 : index
    %0 = vector.load %arg1[%c0, %c0_0] : memref<4x768xf32, #tpu.memory_space<vmem>>, vector<4x768xf32>
    %1 = arith.truncf %0 : vector<4x768xf32> to vector<4x768xbf16>
    %c0_1 = arith.constant 0 : index
    %c0_2 = arith.constant 0 : index
    %2 = vector.load %arg2[%c0_1, %c0_2] : memref<768x4xbf16, #tpu.memory_space<vmem>>, vector<768x4xbf16>
    %cst = arith.constant dense<0.000000e+00> : vector<4x4xf32>
    %3 = tpu.matmul %1, %2, %cst {dimension_numbers = #tpu.dot_dimension_numbers<[1], [0], [0], [1], [0, 0, 1, 1], [], []>} : vector<4x768xbf16>, vector<768x4xbf16>, vector<4x4xf32> -> vector<4x4xf32>
    %c0_3 = arith.constant 0 : index
    %c0_4 = arith.constant 0 : index
    %4 = vector.load %arg3[%c0_3, %c0_4] : memref<1x4xf32, #tpu.memory_space<vmem>>, vector<1x4xf32>
    %5 = vector.broadcast %4 : vector<1x4xf32> to vector<4x4xf32>
    %6 = arith.addf %3, %5 : vector<4x4xf32>
    %c0_5 = arith.constant 0 : index
    %c0_6 = arith.constant 0 : index
    %7 = vector.load %arg4[%c0_5, %c0_6] : memref<4x4xf32, #tpu.memory_space<vmem>>, vector<4x4xf32>
    tpu.vector_store %arg4[%c0_5, %c0_6], %6 {strides = array<i32>} : memref<4x4xf32, #tpu.memory_space<vmem>>, vector<4x4xf32>,
    return
  }
  func.func @transform_0(%arg0: i32) -> (i32, i32) {
    %c0_i32 = arith.constant 0 : i32
    %c0_i32_0 = arith.constant 0 : i32
    return %arg0, %c0_i32 : i32, i32
  }
  func.func @transform_1(%arg0: i32) -> (i32, i32) {
    %c0_i32 = arith.constant 0 : i32
    %c0_i32_0 = arith.constant 0 : i32
    %c0_i32_1 = arith.constant 0 : i32
    return %c0_i32, %c0_i32_0 : i32, i32
  }
  func.func @transform_2(%arg0: i32) -> (i32, i32) {
    %c0_i32 = arith.constant 0 : i32
    %c0_i32_0 = arith.constant 0 : i32
    %c0_i32_1 = arith.constant 0 : i32
    return %c0_i32, %c0_i32_0 : i32, i32
  }
  func.func @transform_3(%arg0: i32) -> (i32, i32) {
    %c0_i32 = arith.constant 0 : i32
    %c0_i32_0 = arith.constant 0 : i32
    return %arg0, %c0_i32 : i32, i32
  }
}

</mosaic_0001>

<bundles_post_ra>
// kernel: tpu_custom_call.1
= control target key start
LH: loop header
LB: loop body
LE: loop exit
PB: predicated region body
PF: predicated region fallthrough
CT: control target
= control target key end

     0   :  { %s930_s0 = inlined_call_operand.vmem [shape: f32[4,768], index: 0, kind: input, shape index: {}]   ;;  %s931_s1 = inlined_call_operand.vmem [shape: bf16[768,4], index: 1, kind: input, shape index: {}]   ;;  %s932_s2 = inlined_call_operand.vmem [shape: f32[1,4], index: 2, kind: input, shape index: {}]   ;;  %s933_s3 = inlined_call_operand.hbm [shape: f32[4,4], index: 3, kind: output, shape index: {}]  }
   0x1   :  { %v677_v0 = vld [vmem:[%s931_s1 + $0x78] sm:$0xff]   ;;  %v681_v4 = vld [vmem:[%s931_s1 + $0x70] sm:$0xff]   ;;  %v685_v8 = vld [vmem:[%s931_s1 + $0x68] sm:$0xff]  }
   0x2   :  { %v678_v1 = vld [vmem:[%s931_s1 + $0x38] sm:$0xff]   ;;  %610 = vmatprep.subr.bf16.mxu0 %v677_v0  ;;  %v682_v5 = vld [vmem:[%s931_s1 + $0x30] sm:$0xff]   ;;  %v686_v9 = vld [vmem:[%s931_s1 + $0x28] sm:$0xff]  }
   0x3   :  { %v679_v2 = vld [vmem:[%s931_s1 + $0xf8] sm:$0xff]   ;;  %611 = vmatpush3.bf16.msra.mxu0 %v678_v1  ;;  %v683_v6 = vld [vmem:[%s931_s1 + $0xf0] sm:$0xff]   ;;  %v687_v10 = vld [vmem:[%s931_s1 + $0xe8] sm:$0xff]  }
   0x4   :  { %v680_v3 = vld [vmem:[%s931_s1 + $0xb8] sm:$0xff]   ;;  %632 = vmatprep.subr.bf16.mxu1 %v679_v2  ;;  %612 = vmatprep.subr.bf16.mxu0 %v681_v4  ;;  %v684_v7 = vld [vmem:[%s931_s1 + $0xb0] sm:$0xff]   ;;  %v688_v11 = vld [vmem:[%s931_s1 + $0xa8] sm:$0xff]  }
   0x5   :  { %633 = vmatpush3.bf16.msra.mxu1 %v680_v3  ;;  %v689_v12 = vld [vmem:[%s931_s1 + $0x60] sm:$0xff]   ;;  %v693_v16 = vld [vmem:[%s931_s1 + $0x58] sm:$0xff]   ;;  %v697_v20 = vld [vmem:[%s931_s1 + $0x50] sm:$0xff]  }
   0x6   :  { %634 = vmatprep.subr.bf16.mxu1 %v683_v6  ;;  %v690_v13 = vld [vmem:[%s931_s1 + $0x20] sm:$0xff]   ;;  %v694_v17 = vld [vmem:[%s931_s1 + $0x18] sm:$0xff]   ;;  %v698_v21 = vld [vmem:[%s931_s1 + $0x10] sm:$0xff]  }
   0x7   :  { %613 = vmatpush3.bf16.msra.mxu0 %v682_v5  ;;  %v691_v14 = vld [vmem:[%s931_s1 + $0xe0] sm:$0xff]   ;;  %v695_v18 = vld [vmem:[%s931_s1 + $0xd8] sm:$0xff]   ;;  %v699_v22 = vld [vmem:[%s931_s1 + $0xd0] sm:$0xff]  }
   0x8   :  { %614 = vmatprep.subr.bf16.mxu0 %v685_v8  ;;  %v692_v15 = vld [vmem:[%s931_s1 + $0xa0] sm:$0xff]   ;;  %v696_v19 = vld [vmem:[%s931_s1 + $0x98] sm:$0xff]   ;;  %v700_v23 = vld [vmem:[%s931_s1 + $0x90] sm:$0xff]  }
   0x9   :  { %635 = vmatpush3.bf16.msra.mxu1 %v684_v7  ;;  %v701_v24 = vld [vmem:[%s931_s1 + $0x48] sm:$0xff]   ;;  %v705_v28 = vld [vmem:[%s931_s1 + $0x40] sm:$0xff]   ;;  %v710_v35 = vld [vmem:[%s931_s1 + $0x178] sm:$0xff]  }
   0xa   :  { %636 = vmatprep.subr.bf16.mxu1 %v687_v10  ;;  %v702_v25 = vld [vmem:[%s931_s1 + $0x8] sm:$0xff]   ;;  %v706_v29 = vld [vmem:[%s931_s1] sm:$0xff]   ;;  %v712_v39 = vld [vmem:[%s931_s1 + $0x138] sm:$0xff]  }
   0xb   :  { %615 = vmatpush3.bf16.msra.mxu0 %v686_v9  ;;  %v703_v26 = vld [vmem:[%s931_s1 + $0xc8] sm:$0xff]   ;;  %v707_v30 = vld [vmem:[%s931_s1 + $0xc0] sm:$0xff]   ;;  %v713_v41 = vld [vmem:[%s931_s1 + $0x170] sm:$0xff]  }
   0xc   :  { %616 = vmatprep.subr.bf16.mxu0 %v689_v12  ;;  %v704_v27 = vld [vmem:[%s931_s1 + $0x88] sm:$0xff]   ;;  %v16_v31 = vld [vmem:[%s930_s0] sm:$0xff]  ;;  %v714_v43 = vld [vmem:[%s931_s1 + $0x130] sm:$0xff]  }
   0xd   :  { %637 = vmatpush3.bf16.msra.mxu1 %v688_v11  ;;  %v22_v32 = vcombine.high %v16_v31, %v16_v31  ;;  %v709_v33 = vld [vmem:[%s931_s1 + $0x80] sm:$0xff]   ;;  %v28_v34 = vpack.c.bf16 %v16_v31, %v16_v31  ;;  %v17_v36 = vld [vmem:[%s930_s0 + $0x8] sm:$0xff]  ;;  %v719_v48 = vld [vmem:[%s931_s1 + $0x158] sm:$0xff]  }
   0xe   :  { %638 = vmatprep.subr.bf16.mxu1 %v691_v14  ;;  %v23_v38 = vcombine.high %v17_v36, %v17_v36  ;;  %v30_v40 = vpack.c.bf16 %v17_v36, %v17_v36  ;;  %v715_v44 = vld [vmem:[%s931_s1 + $0x168] sm:$0xff]   ;;  %v717_v46 = vld [vmem:[%s931_s1 + $0x160] sm:$0xff]   ;;  %v18_v49 = vld [vmem:[%s930_s0 + $0x10] sm:$0xff] }
   0xf   :  { %617 = vmatpush3.bf16.msra.mxu0 %v690_v13  ;;  %v29_v37 = vpack.c.bf16 %v22_v32, %v22_v32  ;;  %v716_v45 = vld [vmem:[%s931_s1 + $0x128] sm:$0xff]   ;;  %v718_v47 = vld [vmem:[%s931_s1 + $0x120] sm:$0xff]   ;;  %v24_v50 = vcombine.high %v18_v49, %v18_v49 }
  0x10   :  { %618 = vmatprep.subr.bf16.mxu0 %v693_v16  ;;  %v31_v42 = vpack.c.bf16 %v23_v38, %v23_v38 }
  0x11   :  { %639 = vmatpush3.bf16.msra.mxu1 %v692_v15  ;;  %457 = vmatprep.mubr.bf16.mxu0 %v29_v37 }
  0x12   :  { %640 = vmatprep.subr.bf16.mxu1 %v695_v18  ;;  %497 = vmatprep.mubr.bf16.mxu1 %v31_v42 }
  0x13   :  { %619 = vmatpush3.bf16.msra.mxu0 %v694_v17 }
  0x14   :  { %620 = vmatprep.subr.bf16.mxu0 %v697_v20 }
  0x15   :  { %641 = vmatpush3.bf16.msra.mxu1 %v696_v19 }
  0x16   :  { %642 = vmatprep.subr.bf16.mxu1 %v699_v22 }
  0x17   :  { %621 = vmatpush3.bf16.msra.mxu0 %v698_v21 }
  0x18   :  { %622 = vmatprep.subr.bf16.mxu0 %v701_v24 }
  0x19   :  { %643 = vmatpush3.bf16.msra.mxu1 %v700_v23 }
  0x1a   :  { %644 = vmatprep.subr.bf16.mxu1 %v703_v26 }
  0x1b   :  { %623 = vmatpush3.bf16.msra.mxu0 %v702_v25 }
  0x1c   :  { %624 = vmatprep.subr.bf16.mxu0 %v705_v28 }
  0x1d   :  { %645 = vmatpush3.bf16.msra.mxu1 %v704_v27 }
  0x1e   :  { %646 = vmatprep.subr.bf16.mxu1 %v707_v30 }
  0x1f   :  { %625 = vmatpush3.bf16.msra.mxu0 %v706_v29 }
  0x20   :  { %654 = vmatprep.subr.bf16.mxu0 %v710_v35 }
  0x21   :  { %647 = vmatpush3.bf16.msra.mxu1 %v709_v33 }
  0x22   :  { %458 = vmatmul.mubr.bf16.vlgmr.msra.gmra.mxu0 %v28_v34 }
  0x23   :  { %655 = vmatpush3.bf16.msra.mxu0 %v712_v39 }
  0x24   :  { %498 = vmatmul.mubr.bf16.vlgmr.msra.gmra.mxu1 %v30_v40  ;;  %656 = vmatprep.subr.bf16.mxu0 %v713_v41 }
  0x27   :  { %657 = vmatpush3.bf16.msra.mxu0 %v714_v43 }
  0x28   :  { %658 = vmatprep.subr.bf16.mxu0 %v715_v44 }
  0x2b   :  { %659 = vmatpush3.bf16.msra.mxu0 %v716_v45 }
  0x2c   :  { %660 = vmatprep.subr.bf16.mxu0 %v717_v46 }
  0x2d   :  { %8 = vsyncpa [#allocation3], 0  ;;  %v720_v51 = vld [vmem:[%s931_s1 + $0x118] sm:$0xff]   ;;  %v721_v52 = vld [vmem:[%s931_s1 + $0x150] sm:$0xff]   ;;  %v33_v53 = vpack.c.bf16 %v24_v50, %v24_v50  ;;  %v32_v59 = vpack.c.bf16 %v18_v49, %v18_v49  ;;  %vm545_vm0 = vcmask 27648  }
  0x2e   :  { %v722_v54 = vld [vmem:[%s931_s1 + $0x110] sm:$0xff]   ;;  %v723_v55 = vld [vmem:[%s931_s1 + $0x148] sm:$0xff]   ;;  %v725_v57 = vld [vmem:[%s931_s1 + $0x140] sm:$0xff]  }
  0x2f   :  { %661 = vmatpush3.bf16.msra.mxu0 %v718_v47  ;;  %537 = vmatprep.mubr.bf16.mxu0 %v33_v53  ;;  %v724_v56 = vld [vmem:[%s931_s1 + $0x108] sm:$0xff]   ;;  %v726_v58 = vld [vmem:[%s931_s1 + $0x100] sm:$0xff]   ;;  %s750_s1 = smov [#allocation2]  }
  0x30   :  { %662 = vmatprep.subr.bf16.mxu0 %v719_v48  ;;  %v561_v5 = vld [vmem:[%s932_s2] ss:$0 sm:$0xff]  ;;  %s553_s7 = sshll.u32 %s750_s1, 4  ;;  %s554_s7 = int_to_ptr.vmem [resolvable:$true] %s553_s7 }
  0x31   :  { %s728_s8 = scalar_lea.vmem %s554_s7, 64  ;;  %p733_p1 = scmp.lt.s32.totalorder %s554_s7, %s554_s7 }
  0x32   :  { %p729_p0 = scmp.ne.s32.totalorder %s554_s7, %s728_s8  ;;  %p734_p2 = scmp.lt.s32.totalorder %s728_s8, %s728_s8 }
  0x33   :  { %663 = vmatpush3.bf16.msra.mxu0 %v720_v51 }
  0x34   :  { %664 = vmatprep.subr.bf16.mxu0 %v721_v52  ;;  %p735_p3 = por %p734_p2, %p733_p1 }
  0x36   :  { %p736_p4 = pnand %p735_p3, %p729_p0 }
  0x37   :  { %665 = vmatpush3.bf16.msra.mxu0 %v722_v54 }
  0x38   :  { %666 = vmatprep.subr.bf16.mxu0 %v723_v55 }
  0x3b   :  { %667 = vmatpush3.bf16.msra.mxu0 %v724_v56 }
  0x3c   :  { %668 = vmatprep.subr.bf16.mxu0 %v725_v57 }
  0x3f   :  { %669 = vmatpush3.bf16.msra.mxu0 %v726_v58 }
  0x42   :  { %538 = vmatmul.mubr.bf16.vlgmr.msra.gmra.mxu0 %v32_v59 }
  0xe2   :  { %v626_v60 = vpop.f32.mrf.mxu0 }
  0xe4   :  { %v627_v61 = vpop.f32.mrf.mxu0  ;;  %v648_v62 = vpop.f32.mrf.mxu1 }
  0xe5   :  { %v628_v4 = vadd.f32 %v627_v61, %v626_v60 }
  0xe6   :  { %v629_v63 = vpop.f32.mrf.mxu0  ;;  %v649_v0 = vpop.f32.mrf.mxu1 }
  0xe7   :  { %v460_v6 = vadd.f32 %v628_v4, %v561_v5  ;;  %v650_v7 = vadd.f32 %v649_v0, %v648_v62 }
  0xe8   :  { %v630_v1 = vpop.f32.mrf.mxu0  ;;  %v651_v2 = vpop.f32.mrf.mxu1 }
  0xe9   :  { %v500_v10 = vadd.f32 %v650_v7, %v460_v6 }
  0xea   :  { %v652_v3 = vpop.f32.mrf.mxu1 }
 0x102   :  { %v670_v8 = vpop.f32.mrf.mxu0 }
 0x104   :  { %v671_v9 = vpop.f32.mrf.mxu0 }
 0x105   :  { %v672_v11 = vadd.f32 %v671_v9, %v670_v8 }
 0x106   :  { %v673_v12 = vpop.f32.mrf.mxu0 }
 0x107   :  { %v540_v13 = vadd.f32 %v672_v11, %v500_v10 }
 0x108   :  { %v674_v14 = vpop.f32.mrf.mxu0 }
 0x109   :  { %546 = vst.msk [vmem:[#allocation2] sm:$0xf] %vm545_vm0, %v540_v13 }
 0x10a   :  { %739 = shalt.err (!%p736_p4)
}
 0x10b   :  { %556 = dma.vmem_to_hbm [thread:$0]  %s554_s7, 64, %s933_s3, [#allocation3]  }
 0x10c   :  { %748 = dma.done.wait [#allocation3], 64  }
 0x10d   :  { %749 = vsyncadd [#allocation3], 4294967232 }
 0x10e   :  { %560 = vsyncpa [#allocation3], 1 }

</bundles_post_ra>
